<compile_context>
chip_gen: v5e
topology: v5e:2x2
jax: 0.10.0
libtpu: 0.0.40
codegen_flags: <defaults>
</compile_context>

<pallas_src>
import jax
import jax.numpy as jnp
from jax.experimental import pallas as pl
from jax.experimental.pallas import tpu as pltpu


def simplecnn_kernel(x_ref,      # (64, 256)   x (203 real cols) + ones col @203 + zeros
                     w1_ref,     # (256, 128)  [conv1 tap1 | tap0]^T, row 203 = [b1 | b1]
                     w2_ref,     # (64, 256)   [conv2 tap1 | tap0]^T
                     fw1_ref,    # (128, 64)   fc1.weight^T
                     fw2_ref,    # (64, 128)   fc2.weight^T, output cols padded to 128
                     b_ref,      # (3, 256) f32: [b2|b2] ; fb1 (64) ; fb2 (nc), zero-padded
                     out_ref):   # (64, 128) f32
    b = b_ref[...]

    # conv1 (both output positions fused along lanes; bias rides in weight row 203) + ReLU
    h1 = jnp.dot(x_ref[...], w1_ref[...], preferred_element_type=jnp.float32)
    h1 = jnp.maximum(h1, 0.0)                          # (64, 128)
    # MaxPool1d(k=2, s=1) over the 2 positions = max over the two 64-wide lane halves
    p1 = jnp.maximum(h1[:, :64], h1[:, 64:])           # (64, 64)

    # conv2 fused + bias + ReLU, then maxpool over the 2 positions (128-wide halves)
    h2 = jnp.dot(p1.astype(w2_ref.dtype), w2_ref[...],
                 preferred_element_type=jnp.float32) + b[0:1, :]
    h2 = jnp.maximum(h2, 0.0)                          # (64, 256)
    p2 = jnp.maximum(h2[:, :128], h2[:, 128:])         # (64, 128)  == x.view(64, -1) for L=1

    # fc1 + ReLU
    f1 = jnp.maximum(
        jnp.dot(p2.astype(fw1_ref.dtype), fw1_ref[...],
                preferred_element_type=jnp.float32) + b[1:2, :64], 0.0)  # (64, 64)

    # fc2 — lane-dense (64, 128) store; padded columns are exact zeros
    out_ref[...] = (jnp.dot(f1.astype(fw2_ref.dtype), fw2_ref[...],
                            preferred_element_type=jnp.float32) + b[2:3, :128])


def simplecnn_forward(x, params, *, compute_dtype=jnp.bfloat16):
    """x: (N, 203, L) float32, PyTorch NCL layout. Requires N == 64, L == 1
    (x.view(64, -1) only matches the natural configuration)."""
    w1, b1, w2, b2, fw1, fb1, fw2, fb2 = params
    n, c_in, l_in = x.shape
    assert c_in == 203 and n == 64 and l_in == 1
    # TODO(synk): for L > 1 PyTorch's x.view(64, -1) mixes channel/length in NCL memory
    # order; only the (natural) L == 1 configuration is reproduced here.
    num_classes = fw2.shape[0]
    c_pad = 256  # contraction dim 203 -> 256 (plus a ones column carrying conv1 bias)

    # ---- input: drop the zero pad planes, append ones column (bias trick), pad to 256
    x2 = x[:, :, 0]                                                   # (64, 203)
    x_aug = jnp.concatenate(
        [x2, jnp.ones((n, 1), x.dtype), jnp.zeros((n, c_pad - c_in - 1), x.dtype)],
        axis=1)                                                       # (64, 256)

    # ---- conv1 fused weight: position0 uses tap1, position1 uses tap0 (zero pad planes)
    w1f = jnp.concatenate([jnp.transpose(w1[:, :, 1]),
                           jnp.transpose(w1[:, :, 0])], axis=1)       # (203, 128)
    bias_row = jnp.concatenate([b1, b1])[None, :]                     # (1, 128)
    w1f = jnp.concatenate(
        [w1f, bias_row, jnp.zeros((c_pad - c_in - 1, 128), w1.dtype)], axis=0)  # (256, 128)

    # ---- conv2 fused weight (64, 256): [tap1 | tap0]
    w2f = jnp.concatenate([jnp.transpose(w2[:, :, 1]),
                           jnp.transpose(w2[:, :, 0])], axis=1)

    # ---- fc weights; fc2 output lanes padded to 128
    fw1t = jnp.transpose(fw1)                                         # (128, 64)
    fw2p = jnp.pad(jnp.transpose(fw2), ((0, 0), (0, 128 - num_classes)))  # (64, 128)

    # ---- stacked biases (single DMA, kept f32 for f32 accumulators)
    bstack = jnp.zeros((3, 256), jnp.float32)
    bstack = bstack.at[0, :].set(jnp.concatenate([b2, b2]))
    bstack = bstack.at[1, :64].set(fb1)
    bstack = bstack.at[2, :num_classes].set(fb2)

    inputs = (
        x_aug.astype(compute_dtype),
        w1f.astype(compute_dtype),
        w2f.astype(compute_dtype),
        fw1t.astype(compute_dtype),
        fw2p.astype(compute_dtype),
        bstack,
    )

    vmem = pl.BlockSpec(memory_space=pltpu.MemorySpace.VMEM)
    out = pl.pallas_call(
        simplecnn_kernel,
        out_shape=jax.ShapeDtypeStruct((64, 128), jnp.float32),
        in_specs=[vmem] * len(inputs),
        out_specs=vmem,
    )(*inputs)
    return out[:, :num_classes]


def torch_style_reference(x, params):
    """Pure-JAX f32 mirror of the PyTorch forward (NCL layout) for validation."""
    w1, b1, w2, b2, fw1, fb1, fw2, fb2 = params

    def conv1d_k2_p1(x_ncl, w, b):
        xpad = jnp.pad(x_ncl, ((0, 0), (0, 0), (1, 1)))
        l_out = x_ncl.shape[2] + 1
        cols = [jnp.einsum('nc,oc->no', xpad[:, :, t], w[:, :, 0])
                + jnp.einsum('nc,oc->no', xpad[:, :, t + 1], w[:, :, 1])
                for t in range(l_out)]
        return jnp.stack(cols, axis=2) + b[None, :, None]

    def maxpool_k2_s1(x_ncl):
        return jnp.maximum(x_ncl[:, :, :-1], x_ncl[:, :, 1:])

    h = maxpool_k2_s1(jax.nn.relu(conv1d_k2_p1(x, w1, b1)))
    h = maxpool_k2_s1(jax.nn.relu(conv1d_k2_p1(h, w2, b2)))
    h = h.reshape(64, -1)
    h = jax.nn.relu(h @ fw1.T + fb1)
    return h @ fw2.T + fb2


if __name__ == "__main__":
    key = jax.random.PRNGKey(0)
    ks = jax.random.split(key, 9)
    num_classes = 10
    N, L = 64, 1                                  # N * L must equal 64 (view(64, -1))

    def u(k, shape, fan_in):
        bound = 1.0 / (fan_in ** 0.5)
        return jax.random.uniform(k, shape, jnp.float32, -bound, bound)

    # Parameter shapes exactly as in SimpleCNN.__init__ (PyTorch conventions).
    w1 = u(ks[0], (64, 203, 2), 203 * 2)          # conv1.weight
    b1 = u(ks[1], (64,), 203 * 2)                 # conv1.bias
    w2 = u(ks[2], (128, 64, 2), 64 * 2)           # conv2.weight
    b2 = u(ks[3], (128,), 64 * 2)                 # conv2.bias
    fw1 = u(ks[4], (64, 128), 128)                # fc1.weight
    fb1 = u(ks[5], (64,), 128)                    # fc1.bias
    fw2 = u(ks[6], (num_classes, 64), 64)         # fc2.weight
    fb2 = u(ks[7], (num_classes,), 64)            # fc2.bias
    params = (w1, b1, w2, b2, fw1, fb1, fw2, fb2)

    x = jax.random.normal(ks[8], (N, 203, L), jnp.float32)

    out = jax.block_until_ready(simplecnn_forward(x, params))
    ref = torch_style_reference(x, params)

    assert out.shape == (64, num_classes)
    # bf16 MXU inputs with f32 accumulation: comfortably within 2e-2.
    assert jnp.allclose(out, ref, atol=2e-2, rtol=2e-2)
    print("KERNEL_OK")
</pallas_src>

<mosaic_0001>
module attributes {stable_mosaic.version = 11 : i64} {
  func.func @simplecnn_kernel(%arg0: memref<64x256xbf16, #tpu.memory_space<vmem>>, %arg1: memref<256x128xbf16, #tpu.memory_space<vmem>>, %arg2: memref<64x256xbf16, #tpu.memory_space<vmem>>, %arg3: memref<128x64xbf16, #tpu.memory_space<vmem>>, %arg4: memref<64x128xbf16, #tpu.memory_space<vmem>>, %arg5: memref<3x256xf32, #tpu.memory_space<vmem>>, %arg6: memref<64x128xf32, #tpu.memory_space<vmem>>) attributes {dimension_semantics = [], scalar_prefetch = 0 : i64, scratch_operands = 0 : i64, tpu.core_type = #tpu.core_type<tc>} {
    %c0 = arith.constant 0 : index
    %c0_0 = arith.constant 0 : index
    %0 = vector.load %arg5[%c0, %c0_0] : memref<3x256xf32, #tpu.memory_space<vmem>>, vector<3x256xf32>
    %c0_1 = arith.constant 0 : index
    %c0_2 = arith.constant 0 : index
    %1 = vector.load %arg0[%c0_1, %c0_2] : memref<64x256xbf16, #tpu.memory_space<vmem>>, vector<64x256xbf16>
    %c0_3 = arith.constant 0 : index
    %c0_4 = arith.constant 0 : index
    %2 = vector.load %arg1[%c0_3, %c0_4] : memref<256x128xbf16, #tpu.memory_space<vmem>>, vector<256x128xbf16>
    %cst = arith.constant dense<0.000000e+00> : vector<64x128xf32>
    %3 = tpu.matmul %1, %2, %cst {dimension_numbers = #tpu.dot_dimension_numbers<[1], [0], [0], [1], [0, 0, 1, 1], [], []>} : vector<64x256xbf16>, vector<256x128xbf16>, vector<64x128xf32> -> vector<64x128xf32>
    %cst_5 = arith.constant 0.000000e+00 : f32
    %4 = vector.broadcast %cst_5 : f32 to vector<64x128xf32>
    %5 = arith.maximumf %3, %4 : vector<64x128xf32>
    %6 = vector.extract_strided_slice %5 {offsets = [0, 0], sizes = [64, 64], strides = [1, 1]} : vector<64x128xf32> to vector<64x64xf32>
    %7 = vector.extract_strided_slice %5 {offsets = [0, 64], sizes = [64, 64], strides = [1, 1]} : vector<64x128xf32> to vector<64x64xf32>
    %8 = arith.maximumf %6, %7 : vector<64x64xf32>
    %9 = arith.truncf %8 : vector<64x64xf32> to vector<64x64xbf16>
    %c0_6 = arith.constant 0 : index
    %c0_7 = arith.constant 0 : index
    %10 = vector.load %arg2[%c0_6, %c0_7] : memref<64x256xbf16, #tpu.memory_space<vmem>>, vector<64x256xbf16>
    %cst_8 = arith.constant dense<0.000000e+00> : vector<64x256xf32>
    %11 = tpu.matmul %9, %10, %cst_8 {dimension_numbers = #tpu.dot_dimension_numbers<[1], [0], [0], [1], [0, 0, 1, 1], [], []>} : vector<64x64xbf16>, vector<64x256xbf16>, vector<64x256xf32> -> vector<64x256xf32>
    %12 = vector.extract_strided_slice %0 {offsets = [0, 0], sizes = [1, 256], strides = [1, 1]} : vector<3x256xf32> to vector<1x256xf32>
    %13 = vector.broadcast %12 : vector<1x256xf32> to vector<64x256xf32>
    %14 = arith.addf %11, %13 : vector<64x256xf32>
    %cst_9 = arith.constant 0.000000e+00 : f32
    %15 = vector.broadcast %cst_9 : f32 to vector<64x256xf32>
    %16 = arith.maximumf %14, %15 : vector<64x256xf32>
    %17 = vector.extract_strided_slice %16 {offsets = [0, 0], sizes = [64, 128], strides = [1, 1]} : vector<64x256xf32> to vector<64x128xf32>
    %18 = vector.extract_strided_slice %16 {offsets = [0, 128], sizes = [64, 128], strides = [1, 1]} : vector<64x256xf32> to vector<64x128xf32>
    %19 = arith.maximumf %17, %18 : vector<64x128xf32>
    %20 = arith.truncf %19 : vector<64x128xf32> to vector<64x128xbf16>
    %c0_10 = arith.constant 0 : index
    %c0_11 = arith.constant 0 : index
    %21 = vector.load %arg3[%c0_10, %c0_11] : memref<128x64xbf16, #tpu.memory_space<vmem>>, vector<128x64xbf16>
    %cst_12 = arith.constant dense<0.000000e+00> : vector<64x64xf32>
    %22 = tpu.matmul %20, %21, %cst_12 {dimension_numbers = #tpu.dot_dimension_numbers<[1], [0], [0], [1], [0, 0, 1, 1], [], []>} : vector<64x128xbf16>, vector<128x64xbf16>, vector<64x64xf32> -> vector<64x64xf32>
    %23 = vector.extract_strided_slice %0 {offsets = [1, 0], sizes = [1, 64], strides = [1, 1]} : vector<3x256xf32> to vector<1x64xf32>
    %24 = vector.broadcast %23 : vector<1x64xf32> to vector<64x64xf32>
    %25 = arith.addf %22, %24 : vector<64x64xf32>
    %cst_13 = arith.constant 0.000000e+00 : f32
    %26 = vector.broadcast %cst_13 : f32 to vector<64x64xf32>
    %27 = arith.maximumf %25, %26 : vector<64x64xf32>
    %28 = arith.truncf %27 : vector<64x64xf32> to vector<64x64xbf16>
    %c0_14 = arith.constant 0 : index
    %c0_15 = arith.constant 0 : index
    %29 = vector.load %arg4[%c0_14, %c0_15] : memref<64x128xbf16, #tpu.memory_space<vmem>>, vector<64x128xbf16>
    %cst_16 = arith.constant dense<0.000000e+00> : vector<64x128xf32>
    %30 = tpu.matmul %28, %29, %cst_16 {dimension_numbers = #tpu.dot_dimension_numbers<[1], [0], [0], [1], [0, 0, 1, 1], [], []>} : vector<64x64xbf16>, vector<64x128xbf16>, vector<64x128xf32> -> vector<64x128xf32>
    %31 = vector.extract_strided_slice %0 {offsets = [2, 0], sizes = [1, 128], strides = [1, 1]} : vector<3x256xf32> to vector<1x128xf32>
    %32 = vector.broadcast %31 : vector<1x128xf32> to vector<64x128xf32>
    %33 = arith.addf %30, %32 : vector<64x128xf32>
    %c0_17 = arith.constant 0 : index
    %c0_18 = arith.constant 0 : index
    %34 = vector.load %arg6[%c0_17, %c0_18] : memref<64x128xf32, #tpu.memory_space<vmem>>, vector<64x128xf32>
    tpu.vector_store %arg6[%c0_17, %c0_18], %33 {strides = array<i32>} : memref<64x128xf32, #tpu.memory_space<vmem>>, vector<64x128xf32>,
    return
  }
}

</mosaic_0001>

<bundles_post_ra>
// kernel: tpu_custom_call.1
= control target key start
LH: loop header
LB: loop body
LE: loop exit
PB: predicated region body
PF: predicated region fallthrough
CT: control target
= control target key end

     0   :  { %11 = vsyncpa [#allocation3], 0  ;;  %s1289_s0 = inlined_call_operand.vmem [shape: bf16[64,256], index: 0, kind: input, shape index: {}]   ;;  %s1290_s1 = inlined_call_operand.hbm [shape: bf16[256,128], index: 1, kind: input, shape index: {}]   ;;  %s1291_s2 = inlined_call_operand.hbm [shape: bf16[64,256], index: 2, kind: input, shape index: {}]   ;;  %s1292_s3 = inlined_call_operand.vmem [shape: bf16[128,64], index: 3, kind: input, shape index: {}]   ;;  %s1293_s4 = inlined_call_operand.vmem [shape: bf16[64,128], index: 4, kind: input, shape index: {}]   ;;  %s1294_s5 = inlined_call_operand.hbm [shape: f32[3,256], index: 5, kind: input, shape index: {}]   ;;  %s1295_s6 = inlined_call_operand.hbm [shape: f32[64,128], index: 6, kind: output, shape index: {}]  }
   0x1   :  { %12 = vsyncpa [#allocation6], 0  ;;  %s33_s23 = sshll.u32 %s1291_s2, 4  ;;  %s34_s23 = int_to_ptr.hbm [resolvable:$true] %s33_s23 }
   0x2   :  { %13 = vsyncpa [#allocation4], 0  ;;  %s1089_s24 = smov [#allocation5]   ;;  %s20_s28 = sshll.u32 %s1290_s1, 4  ;;  %s21_s28 = int_to_ptr.hbm [resolvable:$true] %s20_s28 }
   0x3   :  { %s35_s25 = sshll.u32 %s1089_s24, 4  ;;  %s1090_s29 = smov 128   ;;  %s36_s25 = int_to_ptr.vmem [resolvable:$true] %s35_s25 }
   0x4   :  { %s1091_s30 = smov 8   ;;  %s1092_s7 = smov [#allocation2]  }
   0x5   :  { %41 = dma.hbm_to_vmem [thread:$0]  %s34_s23, 1024, %s36_s25, [#allocation6], %s1090_s29, %s1090_s29, %s1091_s30  }
   0x6   :  { %s22_s8 = sshll.u32 %s1092_s7, 4  ;;  %s1093_s2 = smov 64   ;;  %s23_s8 = int_to_ptr.vmem [resolvable:$true] %s22_s8 }
   0x7   :  { %s1094_s9 = smov 4   ;;  %s51_s12 = sshll.u32 %s1294_s5, 4  ;;  %s52_s12 = int_to_ptr.hbm [resolvable:$true] %s51_s12 }
   0x8   :  { %28 = dma.hbm_to_vmem [thread:$0]  %s21_s28, 2048, %s23_s8, [#allocation3], %s1093_s2, %s1093_s2, %s1094_s9  }
   0x9   :  { %s1095_s1 = smov [#allocation7]  }
   0xa   :  { %s53_s13 = sshll.u32 %s1095_s1, 4  ;;  %s54_s13 = int_to_ptr.vmem [resolvable:$true] %s53_s13 }
   0xb   :  { %56 = dma.hbm_to_vmem [thread:$0]  %s52_s12, 128, %s54_s13, [#allocation6]  }
   0xc   :  { %1083 = dma.done.wait [#allocation3], 2048  }
   0xd   :  { %1084 = vsyncadd [#allocation3], 4294965248 }
   0xe   :  { %1085 = dma.done.wait [#allocation6], 1152  }
   0xf   :  { %1086 = vsyncadd [#allocation6], 4294966144  ;;  %v922_v0 = vld [vmem:[#allocation2 + $0x38] sm:$0xff]  ;;  %v921_v2 = vld [vmem:[#allocation2 + $0x30] sm:$0xff]  ;;  %vm412_vm0 = vcmask 523264  }
  0x10   :  { %v930_v1 = vld [vmem:[#allocation2 + $0x78] sm:$0xff]  ;;  %247 = vmatpush.bf16.msra.mxu0 %v922_v0  ;;  %v929_v3 = vld [vmem:[#allocation2 + $0x70] sm:$0xff]  ;;  %v920_v4 = vld [vmem:[#allocation2 + $0x28] sm:$0xff] }
  0x11   :  { %276 = vmatpush.bf16.msra.mxu1 %v930_v1  ;;  %v928_v5 = vld [vmem:[#allocation2 + $0x68] sm:$0xff]  ;;  %v919_v6 = vld [vmem:[#allocation2 + $0x20] sm:$0xff]  ;;  %v918_v8 = vld [vmem:[#allocation2 + $0x18] sm:$0xff] }
  0x12   :  { %v927_v7 = vld [vmem:[#allocation2 + $0x60] sm:$0xff]  ;;  %v926_v9 = vld [vmem:[#allocation2 + $0x58] sm:$0xff]  ;;  %v917_v10 = vld [vmem:[#allocation2 + $0x10] sm:$0xff] }
  0x13   :  { %v925_v11 = vld [vmem:[#allocation2 + $0x50] sm:$0xff]  ;;  %v916_v12 = vld [vmem:[#allocation2 + $0x8] sm:$0xff]  ;;  %v915_v14 = vld [vmem:[#allocation2] sm:$0xff] }
  0x14   :  { %248 = vmatpush.bf16.msra.mxu0 %v921_v2  ;;  %v924_v13 = vld [vmem:[#allocation2 + $0x48] sm:$0xff]  ;;  %v923_v15 = vld [vmem:[#allocation2 + $0x40] sm:$0xff]  ;;  %v729_v22 = vld [vmem:[%s1289_s0 + $0x10] sm:$0xf] }
  0x15   :  { %277 = vmatpush.bf16.msra.mxu1 %v929_v3  ;;  %v721_v16 = vld [vmem:[%s1289_s0] sm:$0xf]  ;;  %v908_v17 = vld [vmem:[%s1289_s0 + $0x4] sm:$0xf0]  ;;  %v907_v18 = vld [vmem:[%s1289_s0 + $0x4] sm:$0xf] }
  0x16   :  { %v723_v19 = vld [vmem:[%s1289_s0 + $0x8] sm:$0xf0]  ;;  %v722_v20 = vor.u32 %v908_v17, %v721_v16  ;;  %v910_v23 = vld [vmem:[%s1289_s0 + $0x14] sm:$0xf0]  ;;  %v909_v24 = vld [vmem:[%s1289_s0 + $0x14] sm:$0xf] }
  0x17   :  { %v726_v21 = vor.u32 %v907_v18, %v723_v19  ;;  %v731_v25 = vld [vmem:[%s1289_s0 + $0x18] sm:$0xf0]  ;;  %v730_v26 = vor.u32 %v910_v23, %v729_v22  ;;  %v737_v28 = vld [vmem:[%s1289_s0 + $0x20] sm:$0xf]  ;;  %v912_v29 = vld [vmem:[%s1289_s0 + $0x24] sm:$0xf0] }
  0x18   :  { %249 = vmatpush.bf16.msra.mxu0 %v920_v4  ;;  %v734_v27 = vor.u32 %v909_v24, %v731_v25  ;;  %v911_v30 = vld [vmem:[%s1289_s0 + $0x24] sm:$0xf]  ;;  %v739_v31 = vld [vmem:[%s1289_s0 + $0x28] sm:$0xf0]  ;;  %v738_v32 = vor.u32 %v912_v29, %v737_v28  ;;  %v745_v34 = vld [vmem:[%s1289_s0 + $0x30] sm:$0xf] }
  0x19   :  { %278 = vmatpush.bf16.msra.mxu1 %v928_v5  ;;  %v742_v33 = vor.u32 %v911_v30, %v739_v31  ;;  %v914_v35 = vld [vmem:[%s1289_s0 + $0x34] sm:$0xf0]  ;;  %v913_v36 = vld [vmem:[%s1289_s0 + $0x34] sm:$0xf]  ;;  %v747_v37 = vld [vmem:[%s1289_s0 + $0x38] sm:$0xf0] }
  0x1a   :  { %v746_v38 = vor.u32 %v914_v35, %v745_v34  ;;  %v750_v39 = vor.u32 %v913_v36, %v747_v37  ;;  %v841_v58 = vld [vmem:[#allocation5 + $0x30] sm:$0xf]  ;;  %v938_v59 = vld [vmem:[#allocation5 + $0x34] sm:$0xf0]  ;;  %v937_v60 = vld [vmem:[#allocation5 + $0x34] sm:$0xf] }
  0x1b   :  { %v842_v63 = vor.u32 %v938_v59, %v841_v58  ;;  %v843_v0 = vld [vmem:[#allocation5 + $0x38] sm:$0xf0]  ;;  %v833_v1 = vld [vmem:[#allocation5 + $0x20] sm:$0xf]  ;;  %v936_v2 = vld [vmem:[#allocation5 + $0x24] sm:$0xf0] }
  0x1c   :  { %250 = vmatpush.bf16.msra.mxu0 %v919_v6  ;;  %v846_v3 = vor.u32 %v937_v60, %v843_v0  ;;  %v935_v4 = vld [vmem:[#allocation5 + $0x24] sm:$0xf]  ;;  %v835_v5 = vld [vmem:[#allocation5 + $0x28] sm:$0xf0]  ;;  %v834_v6 = vor.u32 %v936_v2, %v833_v1  ;;  %v932_v16 = vld [vmem:[#allocation5 + $0x4] sm:$0xf0] }
  0x1d   :  { %279 = vmatpush.bf16.msra.mxu1 %v927_v7  ;;  %951 = vmatpush.bf16.msra.mxu2 %v842_v63  ;;  %v838_v7 = vor.u32 %v935_v4, %v835_v5  ;;  %v931_v19 = vld [vmem:[#allocation5 + $0x4] sm:$0xf]  ;;  %v942_v0 = vld [vmem:[%s1292_s3 + $0x18] sm:$0xff]  ;;  %v941_v1 = vld [vmem:[%s1292_s3 + $0x10] sm:$0xff]  ;;  %s705_s0 = sshll.u32 %s1295_s6, 4  ;;  %s706_s0 = int_to_ptr.hbm [resolvable:$true] %s705_s0 }
  0x1e   :  { %955 = vmatpush.bf16.msra.mxu3 %v846_v3  ;;  %v940_v2 = vld [vmem:[%s1292_s3 + $0x8] sm:$0xff]  ;;  %v1261_v4 = vld [vmem:[#allocation7] sm:$0x77] }
  0x1f   :  { %v366_v5 = vperm.slane %v1261_v4, 0 }
  0x20   :  { %251 = vmatpush.bf16.msra.mxu0 %v918_v8  ;;  %v825_v8 = vld [vmem:[#allocation5 + $0x10] sm:$0xf] }
  0x21   :  { %280 = vmatpush.bf16.msra.mxu1 %v926_v9  ;;  %v934_v9 = vld [vmem:[#allocation5 + $0x14] sm:$0xf0]  ;;  %952 = vmatpush.bf16.msra.mxu2 %v834_v6 }
  0x22   :  { %956 = vmatpush.bf16.msra.mxu3 %v838_v7 }
  0x24   :  { %252 = vmatpush.bf16.msra.mxu0 %v917_v10  ;;  %v933_v10 = vld [vmem:[#allocation5 + $0x14] sm:$0xf] }
  0x25   :  { %281 = vmatpush.bf16.msra.mxu1 %v925_v11  ;;  %v827_v11 = vld [vmem:[#allocation5 + $0x18] sm:$0xf0] }
  0x28   :  { %253 = vmatpush.bf16.msra.mxu0 %v916_v12  ;;  %v826_v12 = vor.u32 %v934_v9, %v825_v8  ;;  %v370_v9 = vperm.slane %v366_v5, 0 }
  0x29   :  { %282 = vmatpush.bf16.msra.mxu1 %v924_v13 }
  0x2a   :  { %953 = vmatpush.bf16.msra.mxu2 %v826_v12 }
  0x2c   :  { %254 = vmatpush.bf16.msra.mxu0 %v915_v14  ;;  %v830_v14 = vor.u32 %v933_v10, %v827_v11 }
  0x2d   :  { %283 = vmatpush.bf16.msra.mxu1 %v923_v15  ;;  %v817_v15 = vld [vmem:[#allocation5] sm:$0xf] }
  0x2e   :  { %v818_v22 = vor.u32 %v932_v16, %v817_v15  ;;  %957 = vmatpush.bf16.msra.mxu3 %v830_v14 }
  0x2f   :  { %255 = vmatmul.bf16.vlgmr.msra.gmra.mxu0 %v722_v20  ;;  %v819_v20 = vld [vmem:[#allocation5 + $0x8] sm:$0xf0] }
  0x30   :  { %284 = vmatmul.bf16.vlgmr.msra.gmra.mxu1 %v726_v21  ;;  %429 = vmatpush.bf16.msrb.mxu0 %v842_v63  ;;  %v822_v25 = vor.u32 %v931_v19, %v819_v20 }
  0x31   :  { %458 = vmatpush.bf16.msrb.mxu1 %v846_v3  ;;  %954 = vmatpush.bf16.msra.mxu2 %v818_v22  ;;  %v939_v3 = vld [vmem:[%s1292_s3] sm:$0xff] }
  0x32   :  { %958 = vmatpush.bf16.msra.mxu3 %v822_v25 }
  0x34   :  { %430 = vmatpush.bf16.msrb.mxu0 %v834_v6  ;;  %v367_v6 = vperm.slane %v1261_v4, 4 }
  0x35   :  { %459 = vmatpush.bf16.msrb.mxu1 %v838_v7 }
  0x36   :  { %v371_v10 = vperm.slane %v367_v6, 0 }
  0x38   :  { %431 = vmatpush.bf16.msrb.mxu0 %v826_v12 }
  0x39   :  { %460 = vmatpush.bf16.msrb.mxu1 %v830_v14 }
  0x3c   :  { %432 = vmatpush.bf16.msrb.mxu0 %v818_v22 }
  0x3d   :  { %461 = vmatpush.bf16.msrb.mxu1 %v822_v25 }
  0x3f   :  { %260 = vmatmul.bf16.gmra.mxu0 %v730_v26 }
  0x40   :  { %289 = vmatmul.bf16.gmra.mxu1 %v734_v27 }
  0x4f   :  { %265 = vmatmul.bf16.gmra.mxu0 %v738_v32 }
  0x50   :  { %294 = vmatmul.bf16.gmra.mxu1 %v742_v33 }
  0x5f   :  { %270 = vmatmul.bf16.gmra.mxu0 %v746_v38 }
  0x60   :  { %299 = vmatmul.bf16.gmra.mxu1 %v750_v39 }
  0xac   :  { %v256_v40 = vpop.f32.mrf.mxu0 }
  0xad   :  { %v285_v41 = vpop.f32.mrf.mxu1 }
  0xae   :  { %v1194_v42 = vadd.f32 %v285_v41, %v256_v40 }
  0xb0   :  { %v305_v46 = vmax.f32 %v1194_v42, 0.0  ;;  %v946_v42 = vld [vmem:[%s1292_s3 + $0x38] sm:$0xff] }
  0xb1   :  { %576 = vmatpush.bf16.msrb.mxu2 %v946_v42 }
  0xb4   :  { %v258_v43 = vpop.f32.mrf.mxu0 }
  0xb5   :  { %v287_v44 = vpop.f32.mrf.mxu1 }
  0xb6   :  { %v1196_v45 = vadd.f32 %v287_v44, %v258_v43 }
  0xb8   :  { %v306_v47 = vmax.f32 %v1196_v45, 0.0 }
  0xba   :  { %v967_v48 = vpack.i.bf16 %v306_v47, %v305_v46 }
  0xbc   :  { %968 = vrot.lane.b32.xlu0 %v967_v48, %s1093_s2  ;;  %v261_v49 = vpop.f32.mrf.mxu0 }
  0xbd   :  { %v290_v50 = vpop.f32.mrf.mxu1 }
  0xbe   :  { %v1205_v51 = vadd.f32 %v290_v50, %v261_v49 }
  0xc0   :  { %v307_v55 = vmax.f32 %v1205_v51, 0.0 }
  0xc4   :  { %v263_v52 = vpop.f32.mrf.mxu0 }
  0xc5   :  { %v292_v53 = vpop.f32.mrf.mxu1 }
  0xc6   :  { %v1207_v54 = vadd.f32 %v292_v53, %v263_v52 }
  0xc8   :  { %v308_v56 = vmax.f32 %v1207_v54, 0.0  ;;  %v943_v54 = vld [vmem:[%s1292_s3 + $0x20] sm:$0xff] }
  0xca   :  { %v972_v57 = vpack.i.bf16 %v308_v56, %v307_v55 }
  0xcc   :  { %973 = vrot.lane.b32.xlu0 %v972_v57, %s1093_s2  ;;  %v266_v61 = vpop.f32.mrf.mxu0 }
  0xcd   :  { %v295_v62 = vpop.f32.mrf.mxu1 }
  0xce   :  { %v1216_v13 = vadd.f32 %v295_v62, %v266_v61 }
  0xd0   :  { %v309_v23 = vmax.f32 %v1216_v13, 0.0 }
  0xd4   :  { %v268_v17 = vpop.f32.mrf.mxu0 }
  0xd5   :  { %v297_v18 = vpop.f32.mrf.mxu1 }
  0xd6   :  { %v298_v21 = vadd.f32 %v297_v18, %v268_v17 }
  0xd8   :  { %v310_v24 = vmax.f32 %v298_v21, 0.0 }
  0xda   :  { %v977_v26 = vpack.i.bf16 %v310_v24, %v309_v23 }
  0xdc   :  { %978 = vrot.lane.b32.xlu1 %v977_v26, %s1093_s2  ;;  %v271_v27 = vpop.f32.mrf.mxu0 }
  0xdd   :  { %v300_v28 = vpop.f32.mrf.mxu1 }
  0xde   :  { %v301_v29 = vadd.f32 %v300_v28, %v271_v27 }
  0xe0   :  { %v311_v33 = vmax.f32 %v301_v29, 0.0 }
  0xe4   :  { %v273_v30 = vpop.f32.mrf.mxu0 }
  0xe5   :  { %v302_v31 = vpop.f32.mrf.mxu1 }
  0xe6   :  { %v303_v32 = vadd.f32 %v302_v31, %v273_v30 }
  0xe8   :  { %v312_v34 = vmax.f32 %v303_v32, 0.0 }
  0xea   :  { %v982_v35 = vpack.i.bf16 %v312_v34, %v311_v33 }
  0xec   :  { %983 = vrot.lane.b32.xlu1 %v982_v35, %s1093_s2 }
 0x12e   :  { %v969_v36 = vpop.permute.xlu0 %968 }
 0x12f   :  { %v971_v37 = vunpack.i.h.bf16 %v969_v36  ;;  %v970_v38 = vunpack.i.l.bf16 %v969_v36 }
 0x131   :  { %v346_v39 = vmax.f32 %v306_v47, %v971_v37  ;;  %v345_v40 = vmax.f32 %v305_v46, %v970_v38  ;;  %v945_v46 = vld [vmem:[%s1292_s3 + $0x30] sm:$0xff]  ;;  %v944_v47 = vld [vmem:[%s1292_s3 + $0x28] sm:$0xff] }
 0x132   :  { %577 = vmatpush.bf16.msrb.mxu2 %v945_v46 }
 0x133   :  { %v353_v41 = vpack.c.bf16 %v346_v39, %v345_v40 }
 0x135   :  { %847 = vmatmul.msk.bf16.vlgmr.msrb.gmra.mxu0 %vm412_vm0, %v353_v41  ;;  %851 = vmatmul.msk.bf16.vlgmr.msrb.gmra.mxu1 %vm412_vm0, %v353_v41  ;;  %v950_v41 = vld [vmem:[%s1293_s4 + $0x18] sm:$0xff] }
 0x136   :  { %578 = vmatpush.bf16.msrb.mxu2 %v944_v47  ;;  %666 = vmatpush.bf16.msrb.mxu3 %v950_v41 }
 0x13a   :  { %579 = vmatpush.bf16.msrb.mxu2 %v943_v54 }
 0x13e   :  { %v974_v43 = vpop.permute.xlu0 %973  ;;  %580 = vmatpush.bf16.msrb.mxu2 %v942_v0 }
 0x13f   :  { %v976_v44 = vunpack.i.h.bf16 %v974_v43  ;;  %v975_v48 = vunpack.i.l.bf16 %v974_v43  ;;  %v949_v43 = vld [vmem:[%s1293_s4 + $0x10] sm:$0xff] }
 0x140   :  { %667 = vmatpush.bf16.msrb.mxu3 %v949_v43 }
 0x141   :  { %v348_v49 = vmax.f32 %v308_v56, %v976_v44  ;;  %v347_v50 = vmax.f32 %v307_v55, %v975_v48 }
 0x142   :  { %581 = vmatpush.bf16.msrb.mxu2 %v941_v1 }
 0x143   :  { %v354_v45 = vpack.c.bf16 %v348_v49, %v347_v50  ;;  %v948_v49 = vld [vmem:[%s1293_s4 + $0x8] sm:$0xff] }
 0x144   :  { %668 = vmatpush.bf16.msrb.mxu3 %v948_v49 }
 0x145   :  { %848 = vmatmul.msk.bf16.gmra.mxu0 %vm412_vm0, %v354_v45  ;;  %852 = vmatmul.msk.bf16.vlgmr.msra.gmra.mxu3 %vm412_vm0, %v354_v45 }
 0x146   :  { %582 = vmatpush.bf16.msrb.mxu2 %v940_v2 }
 0x14a   :  { %583 = vmatpush.bf16.msrb.mxu2 %v939_v3 }
 0x14e   :  { %v979_v51 = vpop.permute.xlu1 %978 }
 0x14f   :  { %v981_v52 = vunpack.i.h.bf16 %v979_v51  ;;  %v980_v53 = vunpack.i.l.bf16 %v979_v51 }
 0x151   :  { %v350_v55 = vmax.f32 %v310_v24, %v981_v52  ;;  %v349_v56 = vmax.f32 %v309_v23, %v980_v53 }
 0x153   :  { %v355_v57 = vpack.c.bf16 %v350_v55, %v349_v56 }
 0x155   :  { %849 = vmatmul.msk.bf16.vlgmr.msra.gmra.mxu2 %vm412_vm0, %v355_v57  ;;  %853 = vmatmul.msk.bf16.gmra.mxu3 %vm412_vm0, %v355_v57 }
 0x15e   :  { %v984_v58 = vpop.permute.xlu1 %983 }
 0x15f   :  { %v986_v59 = vunpack.i.h.bf16 %v984_v58  ;;  %v985_v60 = vunpack.i.l.bf16 %v984_v58 }
 0x161   :  { %v352_v61 = vmax.f32 %v312_v34, %v986_v59  ;;  %v351_v62 = vmax.f32 %v311_v33, %v985_v60 }
 0x163   :  { %v356_v63 = vpack.c.bf16 %v352_v61, %v351_v62 }
 0x165   :  { %850 = vmatmul.msk.bf16.gmra.mxu2 %vm412_vm0, %v356_v63  ;;  %854 = vmatmul.msk.bf16.gmra.mxu3 %vm412_vm0, %v356_v63 }
 0x1b2   :  { %v434_v7 = vpop.f32.mrf.mxu0  ;;  %v463_v8 = vpop.f32.mrf.mxu1 }
 0x1b3   :  { %v435_v11 = vadd.f32 %v434_v7, %v370_v9  ;;  %v464_v12 = vadd.f32 %v463_v8, %v371_v10 }
 0x1b5   :  { %v483_v15 = vmax.f32 %v435_v11, 0.0  ;;  %v484_v16 = vmax.f32 %v464_v12, 0.0  ;;  %v947_v11 = vld [vmem:[%s1293_s4] sm:$0xff]  ;;  %s1096_s4 = smov [#allocation8]  }
 0x1b6   :  { %669 = vmatpush.bf16.msrb.mxu3 %v947_v11  ;;  %s703_s18 = sshll.u32 %s1096_s4, 4  ;;  %s704_s18 = int_to_ptr.vmem [resolvable:$true] %s703_s18 }
 0x1b7   :  { %v499_v21 = vmax.f32 %v483_v15, %v484_v16 }
 0x1ba   :  { %v436_v13 = vpop.f32.mrf.mxu0  ;;  %v465_v14 = vpop.f32.mrf.mxu1 }
 0x1bb   :  { %v437_v17 = vadd.f32 %v436_v13, %v370_v9  ;;  %v466_v18 = vadd.f32 %v465_v14, %v371_v10  ;;  %v527_v13 = vperm.slane %v1261_v4, 1 }
 0x1bd   :  { %v485_v19 = vmax.f32 %v437_v17, 0.0  ;;  %v486_v20 = vmax.f32 %v466_v18, 0.0 }
 0x1bf   :  { %v500_v22 = vmax.f32 %v485_v19, %v486_v20 }
 0x1c1   :  { %v507_v23 = vpack.c.bf16 %v500_v22, %v499_v21 }
 0x1c2   :  { %v439_v24 = vpop.f32.mrf.mxu0 }
 0x1c3   :  { %584 = vmatmul.bf16.vlgmr.msrb.gmra.mxu2 %v507_v23  ;;  %v440_v28 = vadd.f32 %v439_v24, %v370_v9 }
 0x1c5   :  { %v487_v33 = vmax.f32 %v440_v28, 0.0 }
 0x1c8   :  { %v468_v25 = vpop.f32.mrf.mxu3 }
 0x1c9   :  { %v469_v27 = vadd.f32 %v468_v25, %v371_v10 }
 0x1ca   :  { %v441_v26 = vpop.f32.mrf.mxu0 }
 0x1cb   :  { %v442_v29 = vadd.f32 %v441_v26, %v370_v9  ;;  %v488_v31 = vmax.f32 %v469_v27, 0.0 }
 0x1cd   :  { %v489_v34 = vmax.f32 %v442_v29, 0.0  ;;  %v501_v36 = vmax.f32 %v487_v33, %v488_v31 }
 0x1d0   :  { %v470_v30 = vpop.f32.mrf.mxu3 }
 0x1d1   :  { %v471_v32 = vadd.f32 %v470_v30, %v371_v10 }
 0x1d3   :  { %v490_v35 = vmax.f32 %v471_v32, 0.0 }
 0x1d5   :  { %v502_v37 = vmax.f32 %v489_v34, %v490_v35 }
 0x1d7   :  { %v508_v38 = vpack.c.bf16 %v502_v37, %v501_v36 }
 0x1d8   :  { %v444_v39 = vpop.f32.mrf.mxu2  ;;  %v473_v40 = vpop.f32.mrf.mxu3 }
 0x1d9   :  { %589 = vmatmul.bf16.gmra.mxu2 %v508_v38  ;;  %v445_v44 = vadd.f32 %v444_v39, %v370_v9  ;;  %v474_v48 = vadd.f32 %v473_v40, %v371_v10  ;;  %v625_v39 = vperm.slane %v1261_v4, 2 }
 0x1db   :  { %v491_v42 = vmax.f32 %v445_v44, 0.0  ;;  %v492_v46 = vmax.f32 %v474_v48, 0.0 }
 0x1dd   :  { %v503_v54 = vmax.f32 %v491_v42, %v492_v46 }
 0x1e0   :  { %v446_v50 = vpop.f32.mrf.mxu2  ;;  %v475_v45 = vpop.f32.mrf.mxu3 }
 0x1e1   :  { %v447_v47 = vadd.f32 %v446_v50, %v370_v9  ;;  %v476_v51 = vadd.f32 %v475_v45, %v371_v10 }
 0x1e3   :  { %v493_v52 = vmax.f32 %v447_v47, 0.0  ;;  %v494_v53 = vmax.f32 %v476_v51, 0.0 }
 0x1e5   :  { %v504_v55 = vmax.f32 %v493_v52, %v494_v53 }
 0x1e7   :  { %v509_v56 = vpack.c.bf16 %v504_v55, %v503_v54 }
 0x1e8   :  { %v449_v57 = vpop.f32.mrf.mxu2  ;;  %v478_v58 = vpop.f32.mrf.mxu3 }
 0x1e9   :  { %594 = vmatmul.bf16.gmra.mxu2 %v509_v56  ;;  %v450_v59 = vadd.f32 %v449_v57, %v370_v9  ;;  %v479_v60 = vadd.f32 %v478_v58, %v371_v10 }
 0x1eb   :  { %v495_v63 = vmax.f32 %v450_v59, 0.0  ;;  %v496_v0 = vmax.f32 %v479_v60, 0.0 }
 0x1ed   :  { %v505_v6 = vmax.f32 %v495_v63, %v496_v0 }
 0x1f0   :  { %v451_v61 = vpop.f32.mrf.mxu2  ;;  %v480_v62 = vpop.f32.mrf.mxu3 }
 0x1f1   :  { %v452_v1 = vadd.f32 %v451_v61, %v370_v9  ;;  %v481_v2 = vadd.f32 %v480_v62, %v371_v10 }
 0x1f3   :  { %v497_v3 = vmax.f32 %v452_v1, 0.0  ;;  %v498_v5 = vmax.f32 %v481_v2, 0.0 }
 0x1f5   :  { %v506_v7 = vmax.f32 %v497_v3, %v498_v5 }
 0x1f7   :  { %v510_v8 = vpack.c.bf16 %v506_v7, %v505_v6 }
 0x1f9   :  { %599 = vmatmul.bf16.gmra.mxu2 %v510_v8 }
 0x246   :  { %v585_v12 = vpop.f32.mrf.mxu2 }
 0x247   :  { %v586_v14 = vadd.f32 %v585_v12, %v527_v13 }
 0x249   :  { %v605_v17 = vmax.f32 %v586_v14, 0.0 }
 0x24e   :  { %v587_v15 = vpop.f32.mrf.mxu2 }
 0x24f   :  { %v588_v16 = vadd.f32 %v587_v15, %v527_v13 }
 0x251   :  { %v606_v9 = vmax.f32 %v588_v16, 0.0 }
 0x253   :  { %v613_v10 = vpack.c.bf16 %v606_v9, %v605_v17 }
 0x255   :  { %903 = vmatmul.msk.bf16.vlgmr.msrb.gmra.mxu3 %vm412_vm0, %v613_v10 }
 0x25c   :  { %v590_v18 = vpop.f32.mrf.mxu2 }
 0x25d   :  { %v591_v19 = vadd.f32 %v590_v18, %v527_v13 }
 0x25f   :  { %v607_v22 = vmax.f32 %v591_v19, 0.0 }
 0x264   :  { %v592_v20 = vpop.f32.mrf.mxu2 }
 0x265   :  { %v593_v21 = vadd.f32 %v592_v20, %v527_v13 }
 0x267   :  { %v608_v23 = vmax.f32 %v593_v21, 0.0 }
 0x269   :  { %v614_v24 = vpack.c.bf16 %v608_v23, %v607_v22 }
 0x26b   :  { %904 = vmatmul.msk.bf16.gmra.mxu3 %vm412_vm0, %v614_v24 }
 0x26c   :  { %v595_v25 = vpop.f32.mrf.mxu2 }
 0x26d   :  { %v596_v26 = vadd.f32 %v595_v25, %v527_v13 }
 0x26f   :  { %v609_v29 = vmax.f32 %v596_v26, 0.0 }
 0x274   :  { %v597_v27 = vpop.f32.mrf.mxu2 }
 0x275   :  { %v598_v28 = vadd.f32 %v597_v27, %v527_v13 }
 0x277   :  { %v610_v30 = vmax.f32 %v598_v28, 0.0 }
 0x279   :  { %v615_v31 = vpack.c.bf16 %v610_v30, %v609_v29 }
 0x27b   :  { %905 = vmatmul.msk.bf16.gmra.mxu3 %vm412_vm0, %v615_v31 }
 0x27c   :  { %v600_v32 = vpop.f32.mrf.mxu2 }
 0x27d   :  { %v601_v33 = vadd.f32 %v600_v32, %v527_v13 }
 0x27f   :  { %v611_v36 = vmax.f32 %v601_v33, 0.0 }
 0x284   :  { %v602_v34 = vpop.f32.mrf.mxu2 }
 0x285   :  { %v603_v35 = vadd.f32 %v602_v34, %v527_v13 }
 0x287   :  { %v612_v37 = vmax.f32 %v603_v35, 0.0 }
 0x289   :  { %v616_v38 = vpack.c.bf16 %v612_v37, %v611_v36 }
 0x28b   :  { %906 = vmatmul.msk.bf16.gmra.mxu3 %vm412_vm0, %v616_v38 }
 0x2d8   :  { %v671_v40 = vpop.f32.mrf.mxu3 }
 0x2d9   :  { %v672_v41 = vadd.f32 %v671_v40, %v625_v39 }
 0x2db   :  { %691 = vst [vmem:[#allocation8] sm:$0xff] %v672_v41 }
 0x2e0   :  { %v673_v43 = vpop.f32.mrf.mxu3 }
 0x2e1   :  { %v674_v44 = vadd.f32 %v673_v43, %v625_v39 }
 0x2e3   :  { %692 = vst [vmem:[#allocation8 + $0x8] sm:$0xff] %v674_v44 }
 0x2ee   :  { %v676_v48 = vpop.f32.mrf.mxu3 }
 0x2ef   :  { %v677_v49 = vadd.f32 %v676_v48, %v625_v39 }
 0x2f1   :  { %693 = vst [vmem:[#allocation8 + $0x10] sm:$0xff] %v677_v49 }
 0x2f6   :  { %v678_v50 = vpop.f32.mrf.mxu3 }
 0x2f7   :  { %v679_v45 = vadd.f32 %v678_v50, %v625_v39 }
 0x2f9   :  { %694 = vst [vmem:[#allocation8 + $0x18] sm:$0xff] %v679_v45 }
 0x2fe   :  { %v681_v42 = vpop.f32.mrf.mxu3 }
 0x2ff   :  { %v682_v46 = vadd.f32 %v681_v42, %v625_v39 }
 0x301   :  { %695 = vst [vmem:[#allocation8 + $0x20] sm:$0xff] %v682_v46 }
 0x306   :  { %v683_v47 = vpop.f32.mrf.mxu3 }
 0x307   :  { %v684_v51 = vadd.f32 %v683_v47, %v625_v39 }
 0x309   :  { %696 = vst [vmem:[#allocation8 + $0x28] sm:$0xff] %v684_v51 }
 0x30e   :  { %v686_v52 = vpop.f32.mrf.mxu3 }
 0x30f   :  { %v687_v4 = vadd.f32 %v686_v52, %v625_v39 }
 0x311   :  { %697 = vst [vmem:[#allocation8 + $0x30] sm:$0xff] %v687_v4 }
 0x316   :  { %v688_v53 = vpop.f32.mrf.mxu3 }
 0x317   :  { %v689_v54 = vadd.f32 %v688_v53, %v625_v39 }
 0x319   :  { %698 = vst [vmem:[#allocation8 + $0x38] sm:$0xff] %v689_v54 }
 0x31a   :  { %711 = dma.vmem_to_hbm [thread:$0]  %s704_s18, 1024, %s706_s0, [#allocation4], %s1090_s29, %s1090_s29, %s1091_s30  }
 0x31b   :  { %1087 = dma.done.wait [#allocation4], 1024  }
 0x31c   :  { %1088 = vsyncadd [#allocation4], 4294966272 }
 0x31d   :  { %716 = vsyncpa [#allocation3], 1 }
 0x31e   :  { %717 = vsyncpa [#allocation6], 1 }
 0x31f   :  { %718 = vsyncpa [#allocation4], 1 }

</bundles_post_ra>
